<compile_context>
chip_gen: v6e
topology: v6e:2x2x1
jax: 0.10.0
libtpu: 0.0.40
codegen_flags: <defaults>
</compile_context>

<pallas_src>
import functools
import math

import jax
import jax.numpy as jnp
from jax.experimental import pallas as pl
from jax.experimental.pallas import tpu as pltpu


# ----------------------------------------------------------------------------
# Tiled matmul (+bias, optional fused ReLU) kernel
# ----------------------------------------------------------------------------
def _matmul_kernel(x_ref, w_ref, b_ref, o_ref, acc_ref, *, apply_relu):
    k = pl.program_id(2)

    @pl.when(k == 0)
    def _():
        # Init the f32 accumulator with the broadcast bias -> epilogue is just
        # (ReLU +) cast.
        acc_ref[...] = jnp.broadcast_to(b_ref[...], acc_ref.shape)

    # x tile: (tm, tk) bf16, w tile: (tk, tn) bf16 (weights stored (Din, Dout),
    # no in-kernel transpose); MXU accumulates in f32.
    acc_ref[...] += jnp.dot(x_ref[...], w_ref[...],
                            preferred_element_type=jnp.float32)

    @pl.when(k == pl.num_programs(2) - 1)
    def _():
        y = acc_ref[...]
        if apply_relu:
            y = jnp.maximum(y, 0.0)
        o_ref[...] = y.astype(o_ref.dtype)


def _round_up(x, m):
    return (x + m - 1) // m * m


def _pick_tile(dim, cap, align):
    """Largest multiple of `align` that divides `dim` (a multiple of `align`)
    and is <= cap."""
    if dim <= cap:
        return dim
    units = dim // align
    max_units = max(1, cap // align)
    for d in range(max_units, 0, -1):
        if units % d == 0:
            return align * d
    return align


def pallas_linear(x, w, b, n_out, *, apply_relu=False, out_dtype=None,
                  tm_cap=512, tn_cap=512, tk_cap=512):
    """y = x @ w + b (optionally ReLU'd).

    x: (M, K0) float, w: (Kp, Np) bf16 pre-padded to 128-multiples,
    b: (1, Np) f32. Returns (M, n_out) in out_dtype (default: x.dtype)."""
    M, K0 = x.shape
    Kp, Np = w.shape
    assert Kp % 128 == 0 and Np % 128 == 0 and K0 <= Kp and n_out <= Np
    out_dtype = out_dtype if out_dtype is not None else x.dtype

    # Tile selection: grow toward the caps, keep bf16 (16, 128) alignment.
    tm = min(tm_cap, _round_up(M, 16))
    Mp = _round_up(M, tm)
    tn = _pick_tile(Np, tn_cap, 128)
    tk = _pick_tile(Kp, tk_cap, 128)

    # v7x megacore: make sure at least one "parallel" grid axis has >= 2 blocks.
    if Mp // tm == 1 and Np // tn == 1:
        if Mp >= 32:
            tm = _round_up((Mp + 1) // 2, 16)
            Mp = _round_up(M, tm)
        elif Np >= 256:
            tn = _pick_tile(Np, max(128, Np // 2), 128)

    # Activations: cast to bf16 (halves DMA bytes), pad to tile multiples.
    xp = x.astype(jnp.bfloat16)
    if (Mp, Kp) != (M, K0):
        xp = jnp.pad(xp, ((0, Mp - M), (0, Kp - K0)))

    grid = (Mp // tm, Np // tn, Kp // tk)
    out_itemsize = jnp.dtype(out_dtype).itemsize
    cost = pl.CostEstimate(
        flops=2 * Mp * Np * Kp,
        transcendentals=0,
        # x re-read per N-tile, w re-read per M-tile, output written once.
        bytes_accessed=(2 * Mp * Kp) * (Np // tn)
                       + (2 * Kp * Np) * (Mp // tm)
                       + out_itemsize * Mp * Np,
    )

    out = pl.pallas_call(
        functools.partial(_matmul_kernel, apply_relu=apply_relu),
        out_shape=jax.ShapeDtypeStruct((Mp, Np), out_dtype),
        grid_spec=pltpu.PrefetchScalarGridSpec(
            num_scalar_prefetch=0,
            grid=grid,
            in_specs=[
                pl.BlockSpec((tm, tk), lambda i, j, k: (i, k)),
                pl.BlockSpec((tk, tn), lambda i, j, k: (k, j)),
                pl.BlockSpec((1, tn), lambda i, j, k: (0, j)),
            ],
            out_specs=pl.BlockSpec((tm, tn), lambda i, j, k: (i, j)),
            scratch_shapes=[pltpu.VMEM((tm, tn), jnp.float32)],
        ),
        compiler_params=pltpu.CompilerParams(
            dimension_semantics=("parallel", "parallel", "arbitrary"),
            vmem_limit_bytes=48 * 1024 * 1024),
        cost_estimate=cost,
    )(xp, w, b)

    return out if (Mp, Np) == (M, n_out) else out[:M, :n_out]


# ----------------------------------------------------------------------------
# Conv1d ("same" padding) -> lane-contiguous im2col + tiled matmul
# ----------------------------------------------------------------------------
def _im2col_1d(x, k):
    """x: (B, S, C) -> (B, S, k*C); flat index = j*C + c (tap-major), matching
    the weight permutation in _prep_conv. No-op for k == 1."""
    if k == 1:
        return x
    pad = (k - 1) // 2
    B, S, C = x.shape
    xp = jnp.pad(x, ((0, 0), (pad, pad), (0, 0)))
    return jnp.concatenate([xp[:, j:j + S, :] for j in range(k)], axis=-1)


# ----------------------------------------------------------------------------
# Parameter prep (matches nn.Linear / nn.Conv1d default U(-1/sqrt(fan_in), .))
# Weights are pre-transposed (Din, Dout), pre-padded to 128-multiples and
# pre-cast to bf16 ONCE here, so the per-call path does no weight copies.
# ----------------------------------------------------------------------------
def _pad2(a, rows, cols):
    return jnp.pad(a, ((0, rows - a.shape[0]), (0, cols - a.shape[1])))


def _prep_linear(key, d_in, d_out):
    kw, kb = jax.random.split(key)
    bound = 1.0 / math.sqrt(d_in)
    w = jax.random.uniform(kw, (d_in, d_out), jnp.float32, -bound, bound)
    b = jax.random.uniform(kb, (d_out,), jnp.float32, -bound, bound)
    Kp, Np = _round_up(d_in, 128), _round_up(d_out, 128)
    return dict(
        w=_pad2(w, Kp, Np).astype(jnp.bfloat16),       # (Kp, Np) bf16
        b=jnp.pad(b, (0, Np - d_out)).reshape(1, Np),   # (1, Np) f32
        n_out=d_out, w_ref=w, b_ref=b)


def _prep_conv(key, c_in, c_out, ks):
    kw, kb = jax.random.split(key)
    bound = 1.0 / math.sqrt(c_in * ks)
    w_t = jax.random.uniform(kw, (c_out, c_in, ks), jnp.float32, -bound, bound)  # torch layout
    b = jax.random.uniform(kb, (c_out,), jnp.float32, -bound, bound)
    # Row index j*Cin + c  <->  tap-major im2col layout.
    w_mat = jnp.transpose(w_t, (2, 1, 0)).reshape(ks * c_in, c_out)
    Kp, Np = _round_up(ks * c_in, 128), _round_up(c_out, 128)
    return dict(
        w=_pad2(w_mat, Kp, Np).astype(jnp.bfloat16),
        b=jnp.pad(b, (0, Np - c_out)).reshape(1, Np),
        n_out=c_out, w_t=w_t, b_ref=b)


# ----------------------------------------------------------------------------
# FeedForward module (Pallas forward)
# ----------------------------------------------------------------------------
class FeedForwardPallas:
    def __init__(self, d_model, d_FF, p, network_type, kernel_size=1, *, key):
        self.network_type = network_type
        self.p = p  # dropout prob -- identity in eval mode (see TODO above)
        if network_type == 'CNN':
            assert kernel_size % 2 == 1, 'Kernel Size must be odd number'
            self.kernel_size = kernel_size
            chans = [d_model, d_FF * 4, d_FF // 2, d_FF, d_model]
            keys = jax.random.split(key, len(chans) - 1)
            self.conv_layers = [
                _prep_conv(keys[i], chans[i], chans[i + 1], kernel_size)
                for i in range(len(chans) - 1)
            ]
        else:
            k1, k2 = jax.random.split(key, 2)
            self.lin1 = _prep_linear(k1, d_model, d_FF)
            self.lin2 = _prep_linear(k2, d_FF, d_model)
        # Jit the whole forward so pads/reshapes/slices fuse and dispatch
        # overhead around the pallas_calls disappears.
        self._forward = jax.jit(self._forward_impl)

    def _forward_impl(self, x):
        B, S, D = x.shape
        out_dtype = x.dtype
        if self.network_type == 'CNN':
            h = x
            n = len(self.conv_layers)
            for idx, layer in enumerate(self.conv_layers):
                patches = _im2col_1d(h, self.kernel_size)           # (B, S, k*Cin)
                last = idx == n - 1
                y = pallas_linear(
                    patches.reshape(B * S, -1), layer['w'], layer['b'],
                    layer['n_out'], apply_relu=not last,
                    out_dtype=(out_dtype if last else jnp.bfloat16))
                h = y.reshape(B, S, -1)
            return h
        else:
            h = pallas_linear(x.reshape(B * S, D), self.lin1['w'], self.lin1['b'],
                              self.lin1['n_out'], apply_relu=True,
                              out_dtype=jnp.bfloat16)
            out = pallas_linear(h, self.lin2['w'], self.lin2['b'],
                                self.lin2['n_out'], apply_relu=False,
                                out_dtype=out_dtype)
            return out.reshape(B, S, D)

    def __call__(self, x):
        return self._forward(x)


# ----------------------------------------------------------------------------
# Pure-JAX references (independent math path, mirroring the bf16 quantization
# of inputs/weights/intermediates) for correctness checks
# ----------------------------------------------------------------------------
def _q(a):  # bf16 round-trip
    return a.astype(jnp.bfloat16).astype(jnp.float32)


def _ref_conv1d_same(x, w_t, b):
    # x: (B, S, Cin), w_t: (Cout, Cin, k)
    k = w_t.shape[-1]
    pad = (k - 1) // 2
    S = x.shape[1]
    xp = jnp.pad(x, ((0, 0), (pad, pad), (0, 0)))
    y = sum(jnp.einsum('bsc,oc->bso', xp[:, j:j + S, :], w_t[:, :, j])
            for j in range(k))
    return y + b


def reference_feedforward(ff, x):
    if ff.network_type == 'CNN':
        h = x
        n = len(ff.conv_layers)
        for idx, layer in enumerate(ff.conv_layers):
            y = _ref_conv1d_same(_q(h), _q(layer['w_t']), layer['b_ref'])
            if idx < n - 1:
                y = _q(jnp.maximum(y, 0.0))    # bf16 intermediate like Pallas path
            h = y
        return h
    else:
        w1, b1 = _q(ff.lin1['w_ref']), ff.lin1['b_ref']
        w2, b2 = _q(ff.lin2['w_ref']), ff.lin2['b_ref']
        h = _q(jnp.maximum(_q(x) @ w1 + b1, 0.0))
        return h @ w2 + b2


# ----------------------------------------------------------------------------
if __name__ == "__main__":
    d_model, d_FF, p = 32, 64, 0.1
    batch, seq = 2, 8

    key = jax.random.PRNGKey(0)
    k_mlp, k_cnn, k_x = jax.random.split(key, 3)
    x = jax.random.normal(k_x, (batch, seq, d_model), jnp.float32)

    # MLP path
    ff_mlp = FeedForwardPallas(d_model, d_FF, p, network_type='MLP', key=k_mlp)
    out_mlp = jax.block_until_ready(ff_mlp(x))
    ref_mlp = reference_feedforward(ff_mlp, x)
    assert out_mlp.shape == (batch, seq, d_model)
    assert jnp.allclose(out_mlp, ref_mlp, atol=1e-2, rtol=1e-2), "MLP mismatch"

    # CNN path (kernel_size=3, "same" padding)
    ff_cnn = FeedForwardPallas(d_model, d_FF, p, network_type='CNN',
                               kernel_size=3, key=k_cnn)
    out_cnn = jax.block_until_ready(ff_cnn(x))
    ref_cnn = reference_feedforward(ff_cnn, x)
    assert out_cnn.shape == (batch, seq, d_model)
    assert jnp.allclose(out_cnn, ref_cnn, atol=1e-2, rtol=1e-2), "CNN mismatch"

    print("KERNEL_OK")
</pallas_src>

<mosaic_0001>
module attributes {stable_mosaic.version = 11 : i64} {
  func.func @_matmul_kernel(%arg0: i32, %arg1: i32, %arg2: i32, %arg3: memref<16x128xbf16, #tpu.memory_space<vmem>>, %arg4: memref<128x128xbf16, #tpu.memory_space<vmem>>, %arg5: memref<1x128xf32, #tpu.memory_space<vmem>>, %arg6: memref<16x128xbf16, #tpu.memory_space<vmem>>, %arg7: memref<16x128xf32, #tpu.memory_space<vmem>>) attributes {dimension_semantics = [#tpu.dimension_semantics<parallel>, #tpu.dimension_semantics<parallel>, #tpu.dimension_semantics<arbitrary>], iteration_bounds = array<i64: 1, 1, 1>, scalar_prefetch = 0 : i64, scratch_operands = 1 : i64, tpu.core_type = #tpu.core_type<tc>, window_params = [{transform_indices = @transform_0, window_bounds = array<i64: 16, 128>}, {transform_indices = @transform_1, window_bounds = array<i64: 128, 128>}, {transform_indices = @transform_2, window_bounds = array<i64: 1, 128>}, {transform_indices = @transform_3, window_bounds = array<i64: 16, 128>}]} {
    %c0_i32 = arith.constant 0 : i32
    %0 = arith.cmpi eq, %arg2, %c0_i32 : i32
    %1 = arith.extui %0 : i1 to i32
    %c0_i32_0 = arith.constant 0 : i32
    %2 = arith.cmpi ne, %1, %c0_i32_0 : i32
    scf.if %2 {
      %c0_10 = arith.constant 0 : index
      %c0_11 = arith.constant 0 : index
      %12 = vector.load %arg5[%c0_10, %c0_11] : memref<1x128xf32, #tpu.memory_space<vmem>>, vector<1x128xf32>
      %13 = vector.shape_cast %12 : vector<1x128xf32> to vector<1x128xf32>
      %14 = vector.broadcast %13 : vector<1x128xf32> to vector<16x128xf32>
      %c0_12 = arith.constant 0 : index
      %c0_13 = arith.constant 0 : index
      %15 = vector.load %arg7[%c0_12, %c0_13] : memref<16x128xf32, #tpu.memory_space<vmem>>, vector<16x128xf32>
      tpu.vector_store %arg7[%c0_12, %c0_13], %14 {strides = array<i32>} : memref<16x128xf32, #tpu.memory_space<vmem>>, vector<16x128xf32>,
    } else {
    }
    %c0 = arith.constant 0 : index
    %c0_1 = arith.constant 0 : index
    %3 = vector.load %arg7[%c0, %c0_1] : memref<16x128xf32, #tpu.memory_space<vmem>>, vector<16x128xf32>
    %c0_2 = arith.constant 0 : index
    %c0_3 = arith.constant 0 : index
    %4 = vector.load %arg3[%c0_2, %c0_3] : memref<16x128xbf16, #tpu.memory_space<vmem>>, vector<16x128xbf16>
    %c0_4 = arith.constant 0 : index
    %c0_5 = arith.constant 0 : index
    %5 = vector.load %arg4[%c0_4, %c0_5] : memref<128x128xbf16, #tpu.memory_space<vmem>>, vector<128x128xbf16>
    %cst = arith.constant dense<0.000000e+00> : vector<16x128xf32>
    %6 = tpu.matmul %4, %5, %cst {dimension_numbers = #tpu.dot_dimension_numbers<[1], [0], [0], [1], [0, 0, 1, 1], [], []>} : vector<16x128xbf16>, vector<128x128xbf16>, vector<16x128xf32> -> vector<16x128xf32>
    %7 = arith.addf %3, %6 : vector<16x128xf32>
    %c0_6 = arith.constant 0 : index
    %c0_7 = arith.constant 0 : index
    %8 = vector.load %arg7[%c0_6, %c0_7] : memref<16x128xf32, #tpu.memory_space<vmem>>, vector<16x128xf32>
    tpu.vector_store %arg7[%c0_6, %c0_7], %7 {strides = array<i32>} : memref<16x128xf32, #tpu.memory_space<vmem>>, vector<16x128xf32>,
    %c0_i32_8 = arith.constant 0 : i32
    %9 = arith.cmpi eq, %arg2, %c0_i32_8 : i32
    %10 = arith.extui %9 : i1 to i32
    %c0_i32_9 = arith.constant 0 : i32
    %11 = arith.cmpi ne, %10, %c0_i32_9 : i32
    scf.if %11 {
      %c0_10 = arith.constant 0 : index
      %c0_11 = arith.constant 0 : index
      %12 = vector.load %arg7[%c0_10, %c0_11] : memref<16x128xf32, #tpu.memory_space<vmem>>, vector<16x128xf32>
      %cst_12 = arith.constant 0.000000e+00 : f32
      %13 = vector.broadcast %cst_12 : f32 to vector<16x128xf32>
      %14 = arith.maximumf %12, %13 : vector<16x128xf32>
      %15 = arith.truncf %14 : vector<16x128xf32> to vector<16x128xbf16>
      %c0_13 = arith.constant 0 : index
      %c0_14 = arith.constant 0 : index
      %16 = vector.load %arg6[%c0_13, %c0_14] : memref<16x128xbf16, #tpu.memory_space<vmem>>, vector<16x128xbf16>
      tpu.vector_store %arg6[%c0_13, %c0_14], %15 {strides = array<i32>} : memref<16x128xbf16, #tpu.memory_space<vmem>>, vector<16x128xbf16>,
    } else {
    }
    return
  }
  func.func @transform_0(%arg0: i32, %arg1: i32, %arg2: i32) -> (i32, i32) {
    %c0_i32 = arith.constant 0 : i32
    return %arg0, %arg2 : i32, i32
  }
  func.func @transform_1(%arg0: i32, %arg1: i32, %arg2: i32) -> (i32, i32) {
    %c0_i32 = arith.constant 0 : i32
    return %arg2, %arg1 : i32, i32
  }
  func.func @transform_2(%arg0: i32, %arg1: i32, %arg2: i32) -> (i32, i32) {
    %c0_i32 = arith.constant 0 : i32
    %c0_i32_0 = arith.constant 0 : i32
    return %c0_i32, %arg1 : i32, i32
  }
  func.func @transform_3(%arg0: i32, %arg1: i32, %arg2: i32) -> (i32, i32) {
    %c0_i32 = arith.constant 0 : i32
    return %arg0, %arg1 : i32, i32
  }
}

module attributes {stable_mosaic.version = 11 : i64} {
  func.func @_matmul_kernel(%arg0: i32, %arg1: i32, %arg2: i32, %arg3: memref<16x128xbf16, #tpu.memory_space<vmem>>, %arg4: memref<128x128xbf16, #tpu.memory_space<vmem>>, %arg5: memref<1x128xf32, #tpu.memory_space<vmem>>, %arg6: memref<16x128xf32, #tpu.memory_space<vmem>>, %arg7: memref<16x128xf32, #tpu.memory_space<vmem>>) attributes {dimension_semantics = [#tpu.dimension_semantics<parallel>, #tpu.dimension_semantics<parallel>, #tpu.dimension_semantics<arbitrary>], iteration_bounds = array<i64: 1, 1, 1>, scalar_prefetch = 0 : i64, scratch_operands = 1 : i64, tpu.core_type = #tpu.core_type<tc>, window_params = [{transform_indices = @transform_0, window_bounds = array<i64: 16, 128>}, {transform_indices = @transform_1, window_bounds = array<i64: 128, 128>}, {transform_indices = @transform_2, window_bounds = array<i64: 1, 128>}, {transform_indices = @transform_3, window_bounds = array<i64: 16, 128>}]} {
    %c0_i32 = arith.constant 0 : i32
    %0 = arith.cmpi eq, %arg2, %c0_i32 : i32
    %1 = arith.extui %0 : i1 to i32
    %c0_i32_0 = arith.constant 0 : i32
    %2 = arith.cmpi ne, %1, %c0_i32_0 : i32
    scf.if %2 {
      %c0_10 = arith.constant 0 : index
      %c0_11 = arith.constant 0 : index
      %12 = vector.load %arg5[%c0_10, %c0_11] : memref<1x128xf32, #tpu.memory_space<vmem>>, vector<1x128xf32>
      %13 = vector.shape_cast %12 : vector<1x128xf32> to vector<1x128xf32>
      %14 = vector.broadcast %13 : vector<1x128xf32> to vector<16x128xf32>
      %c0_12 = arith.constant 0 : index
      %c0_13 = arith.constant 0 : index
      %15 = vector.load %arg7[%c0_12, %c0_13] : memref<16x128xf32, #tpu.memory_space<vmem>>, vector<16x128xf32>
      tpu.vector_store %arg7[%c0_12, %c0_13], %14 {strides = array<i32>} : memref<16x128xf32, #tpu.memory_space<vmem>>, vector<16x128xf32>,
    } else {
    }
    %c0 = arith.constant 0 : index
    %c0_1 = arith.constant 0 : index
    %3 = vector.load %arg7[%c0, %c0_1] : memref<16x128xf32, #tpu.memory_space<vmem>>, vector<16x128xf32>
    %c0_2 = arith.constant 0 : index
    %c0_3 = arith.constant 0 : index
    %4 = vector.load %arg3[%c0_2, %c0_3] : memref<16x128xbf16, #tpu.memory_space<vmem>>, vector<16x128xbf16>
    %c0_4 = arith.constant 0 : index
    %c0_5 = arith.constant 0 : index
    %5 = vector.load %arg4[%c0_4, %c0_5] : memref<128x128xbf16, #tpu.memory_space<vmem>>, vector<128x128xbf16>
    %cst = arith.constant dense<0.000000e+00> : vector<16x128xf32>
    %6 = tpu.matmul %4, %5, %cst {dimension_numbers = #tpu.dot_dimension_numbers<[1], [0], [0], [1], [0, 0, 1, 1], [], []>} : vector<16x128xbf16>, vector<128x128xbf16>, vector<16x128xf32> -> vector<16x128xf32>
    %7 = arith.addf %3, %6 : vector<16x128xf32>
    %c0_6 = arith.constant 0 : index
    %c0_7 = arith.constant 0 : index
    %8 = vector.load %arg7[%c0_6, %c0_7] : memref<16x128xf32, #tpu.memory_space<vmem>>, vector<16x128xf32>
    tpu.vector_store %arg7[%c0_6, %c0_7], %7 {strides = array<i32>} : memref<16x128xf32, #tpu.memory_space<vmem>>, vector<16x128xf32>,
    %c0_i32_8 = arith.constant 0 : i32
    %9 = arith.cmpi eq, %arg2, %c0_i32_8 : i32
    %10 = arith.extui %9 : i1 to i32
    %c0_i32_9 = arith.constant 0 : i32
    %11 = arith.cmpi ne, %10, %c0_i32_9 : i32
    scf.if %11 {
      %c0_10 = arith.constant 0 : index
      %c0_11 = arith.constant 0 : index
      %12 = vector.load %arg7[%c0_10, %c0_11] : memref<16x128xf32, #tpu.memory_space<vmem>>, vector<16x128xf32>
      %c0_12 = arith.constant 0 : index
      %c0_13 = arith.constant 0 : index
      %13 = vector.load %arg6[%c0_12, %c0_13] : memref<16x128xf32, #tpu.memory_space<vmem>>, vector<16x128xf32>
      tpu.vector_store %arg6[%c0_12, %c0_13], %12 {strides = array<i32>} : memref<16x128xf32, #tpu.memory_space<vmem>>, vector<16x128xf32>,
    } else {
    }
    return
  }
  func.func @transform_0(%arg0: i32, %arg1: i32, %arg2: i32) -> (i32, i32) {
    %c0_i32 = arith.constant 0 : i32
    return %arg0, %arg2 : i32, i32
  }
  func.func @transform_1(%arg0: i32, %arg1: i32, %arg2: i32) -> (i32, i32) {
    %c0_i32 = arith.constant 0 : i32
    return %arg2, %arg1 : i32, i32
  }
  func.func @transform_2(%arg0: i32, %arg1: i32, %arg2: i32) -> (i32, i32) {
    %c0_i32 = arith.constant 0 : i32
    %c0_i32_0 = arith.constant 0 : i32
    return %c0_i32, %arg1 : i32, i32
  }
  func.func @transform_3(%arg0: i32, %arg1: i32, %arg2: i32) -> (i32, i32) {
    %c0_i32 = arith.constant 0 : i32
    return %arg0, %arg1 : i32, i32
  }
}

</mosaic_0001>

<bundles_post_ra>
// kernel: _forward_impl.2
= control target key start
LH: loop header
LB: loop body
LE: loop exit
PB: predicated region body
PF: predicated region fallthrough
CT: control target
= control target key end

     0   :  { %8 = vsyncpa [#allocation4], 0  ;;  %s267_s12 = smov [#allocation3]   ;;  %s304_s0 = inlined_call_operand.vmem [shape: bf16[16,128], index: 0, kind: input, shape index: {}]   ;;  %s305_s1 = inlined_call_operand.hbm [shape: bf16[128,128], index: 1, kind: input, shape index: {}]   ;;  %s306_s2 = inlined_call_operand.vmem [shape: f32[1,128], index: 2, kind: input, shape index: {}]   ;;  %s307_s3 = inlined_call_operand.vmem [shape: bf16[16,128], index: 3, kind: output, shape index: {}]  }
   0x1   :  { %s16_s13 = sshll.u32 %s267_s12, 4  ;;  %s17_s13 = int_to_ptr.vmem [resolvable:$true] %s16_s13 }
   0x2   :  { %s253_s14 = scalar_lea.vmem %s17_s13, 1024  ;;  %p258_p1 = scmp.lt.s32.totalorder %s17_s13, %s17_s13 }
   0x3   :  { %p254_p0 = scmp.ne.s32.totalorder %s17_s13, %s253_s14  ;;  %p259_p2 = scmp.lt.s32.totalorder %s253_s14, %s253_s14 }
   0x5   :  { %p260_p3 = por %p259_p2, %p258_p1 }
   0x7   :  { %p261_p4 = pnand %p260_p3, %p254_p0 }
   0x9   :  { %264 = shalt.err (!%p261_p4)
}
   0xa   :  { %s268_s15 = smov 64   ;;  %s269_s16 = smov 4  }
   0xb   :  { %22 = dma.hbm_to_vmem [thread:$0]  %s305_s1, 1024, %s17_s13, [#allocation4], %s268_s15, %s268_s15, %s269_s16  }
   0xc   :  { %265 = dma.done.wait [#allocation4], 1024  }
   0xd   :  { %266 = vsyncadd [#allocation4], 4294966272  ;;  %v270_v0 = vmov 0.0   ;;  %vm271_vm0 = vmmov 0   ;;  %v236_v1 = vld [vmem:[#allocation3 + $0x38] sm:$0xff]   ;;  %v237_v2 = vld [vmem:[#allocation3 + $0x30] sm:$0xff]  }
   0xe   :  { %211 = vmatprep.subr.bf16.mxu0 %v270_v0  ;;  %227 = vmatprep.mubr.msk.bf16.mxu0 %vm271_vm0, %v270_v0  ;;  %v238_v3 = vld [vmem:[#allocation3 + $0x28] sm:$0xff]   ;;  %v239_v4 = vld [vmem:[#allocation3 + $0x20] sm:$0xff]   ;;  %v240_v5 = vld [vmem:[#allocation3 + $0x18] sm:$0xff]  }
   0xf   :  { %212 = vmatpush3.bf16.msra.mxu0 %v236_v1  ;;  %v241_v6 = vld [vmem:[#allocation3 + $0x10] sm:$0xff]   ;;  %v242_v7 = vld [vmem:[#allocation3 + $0x8] sm:$0xff]   ;;  %v243_v8 = vld [vmem:[#allocation3] sm:$0xff]  }
  0x10   :  { %213 = vmatprep.subr.bf16.mxu0 %v270_v0  ;;  %v244_v9 = vld [vmem:[%s304_s0] sm:$0xff]  }
  0x11   :  { %v183_v10 = vld [vmem:[%s306_s2] ss:$0 sm:$0xff] }
  0x13   :  { %214 = vmatpush3.bf16.msra.mxu0 %v237_v2 }
  0x14   :  { %215 = vmatprep.subr.bf16.mxu0 %v270_v0 }
  0x17   :  { %216 = vmatpush3.bf16.msra.mxu0 %v238_v3 }
  0x18   :  { %217 = vmatprep.subr.bf16.mxu0 %v270_v0 }
  0x1b   :  { %218 = vmatpush3.bf16.msra.mxu0 %v239_v4 }
  0x1c   :  { %219 = vmatprep.subr.bf16.mxu0 %v270_v0 }
  0x1f   :  { %220 = vmatpush3.bf16.msra.mxu0 %v240_v5 }
  0x20   :  { %221 = vmatprep.subr.bf16.mxu0 %v270_v0 }
  0x23   :  { %222 = vmatpush3.bf16.msra.mxu0 %v241_v6 }
  0x24   :  { %223 = vmatprep.subr.bf16.mxu0 %v270_v0 }
  0x27   :  { %224 = vmatpush3.bf16.msra.mxu0 %v242_v7 }
  0x28   :  { %225 = vmatprep.subr.bf16.mxu0 %v270_v0 }
  0x2b   :  { %226 = vmatpush3.bf16.msra.mxu0 %v243_v8 }
  0x2e   :  { %228 = vmatmul.mubr.bf16.vlgmr.msra.gmra.mxu0 %v244_v9 }
  0xee   :  { %v150_v11 = vpop.f32.mrf.mxu0 }
  0xef   :  { %v157_v13 = vadd.f32 %v183_v10, %v150_v11 }
  0xf0   :  { %v229_v12 = vpop.f32.mrf.mxu0 }
  0xf1   :  { %v166_v17 = vmax.f32 %v157_v13, 0.0 }
  0xf2   :  { %v153_v14 = vpop.f32.mrf.mxu0 }
  0xf3   :  { %v158_v15 = vadd.f32 %v183_v10, %v153_v14 }
  0xf4   :  { %v230_v16 = vpop.f32.mrf.mxu0 }
  0xf5   :  { %v167_v18 = vmax.f32 %v158_v15, 0.0 }
  0xf7   :  { %v200_v19 = vpack.c.bf16 %v167_v18, %v166_v17 }
  0xf9   :  { %201 = vst [vmem:[%s307_s3] sm:$0xff] %v200_v19  }
  0xfa   :  { %182 = vsyncpa [#allocation4], 1 }

// kernel: _forward_impl.3
= control target key start
LH: loop header
LB: loop body
LE: loop exit
PB: predicated region body
PF: predicated region fallthrough
CT: control target
= control target key end

     0   :  { %v208_v0 = vmov 0.0   ;;  %vm209_vm0 = vmmov 0   ;;  %s266_s1 = inlined_call_operand.vmem [shape: bf16[128,128], index: 1, kind: input, shape index: {}]   ;;  %s267_s0 = inlined_call_operand.vmem [shape: bf16[16,128], index: 0, kind: input, shape index: {}]   ;;  %s268_s2 = inlined_call_operand.vmem [shape: f32[1,128], index: 2, kind: input, shape index: {}]   ;;  %s269_s3 = inlined_call_operand.vmem [shape: f32[16,128], index: 3, kind: output, shape index: {}]  }
   0x1   :  { %177 = vmatprep.subr.bf16.mxu0 %v208_v0  ;;  %v199_v1 = vld [vmem:[%s266_s1 + $0x38] sm:$0xff]   ;;  %193 = vmatprep.mubr.msk.bf16.mxu0 %vm209_vm0, %v208_v0  ;;  %v200_v2 = vld [vmem:[%s266_s1 + $0x30] sm:$0xff]   ;;  %v201_v3 = vld [vmem:[%s266_s1 + $0x28] sm:$0xff]  }
   0x2   :  { %178 = vmatpush3.bf16.msra.mxu0 %v199_v1  ;;  %v202_v4 = vld [vmem:[%s266_s1 + $0x20] sm:$0xff]   ;;  %v203_v5 = vld [vmem:[%s266_s1 + $0x18] sm:$0xff]   ;;  %v204_v6 = vld [vmem:[%s266_s1 + $0x10] sm:$0xff]  }
   0x3   :  { %179 = vmatprep.subr.bf16.mxu0 %v208_v0  ;;  %v205_v7 = vld [vmem:[%s266_s1 + $0x8] sm:$0xff]   ;;  %v206_v8 = vld [vmem:[%s266_s1] sm:$0xff]  }
   0x4   :  { %v207_v9 = vld [vmem:[%s267_s0] sm:$0xff]  }
   0x5   :  { %v158_v10 = vld [vmem:[%s268_s2] ss:$0 sm:$0xff] }
   0x6   :  { %180 = vmatpush3.bf16.msra.mxu0 %v200_v2 }
   0x7   :  { %181 = vmatprep.subr.bf16.mxu0 %v208_v0 }
   0xa   :  { %182 = vmatpush3.bf16.msra.mxu0 %v201_v3 }
   0xb   :  { %183 = vmatprep.subr.bf16.mxu0 %v208_v0 }
   0xe   :  { %184 = vmatpush3.bf16.msra.mxu0 %v202_v4 }
   0xf   :  { %185 = vmatprep.subr.bf16.mxu0 %v208_v0 }
  0x12   :  { %186 = vmatpush3.bf16.msra.mxu0 %v203_v5 }
  0x13   :  { %187 = vmatprep.subr.bf16.mxu0 %v208_v0 }
  0x16   :  { %188 = vmatpush3.bf16.msra.mxu0 %v204_v6 }
  0x17   :  { %189 = vmatprep.subr.bf16.mxu0 %v208_v0 }
  0x1a   :  { %190 = vmatpush3.bf16.msra.mxu0 %v205_v7 }
  0x1b   :  { %191 = vmatprep.subr.bf16.mxu0 %v208_v0 }
  0x1e   :  { %192 = vmatpush3.bf16.msra.mxu0 %v206_v8 }
  0x21   :  { %194 = vmatmul.mubr.bf16.vlgmr.msra.gmra.mxu0 %v207_v9 }
  0xe1   :  { %v136_v11 = vpop.f32.mrf.mxu0 }
  0xe2   :  { %v143_v12 = vadd.f32 %v158_v10, %v136_v11 }
  0xe3   :  { %v195_v13 = vpop.f32.mrf.mxu0 }
  0xe4   :  { %152 = vst [vmem:[%s269_s3] sm:$0xff] %v143_v12 }
  0xe5   :  { %v139_v14 = vpop.f32.mrf.mxu0 }
  0xe6   :  { %v144_v15 = vadd.f32 %v158_v10, %v139_v14 }
  0xe7   :  { %v196_v16 = vpop.f32.mrf.mxu0 }
  0xe8   :  { %153 = vst [vmem:[%s269_s3 + $0x8] sm:$0xff] %v144_v15 }

</bundles_post_ra>
